<compile_context>
chip_gen: v6e
topology: v6e:2x2x1
jax: 0.10.0
libtpu: 0.0.40
codegen_flags: <defaults>
</compile_context>

<pallas_src>
import functools

import jax
import jax.numpy as jnp
from jax.experimental import pallas as pl
from jax.experimental.pallas import tpu as pltpu

_LANE = 128  # lane width used to pad the hidden/compute feature axis


def _round_up(x, m):
    return ((x + m - 1) // m) * m


def _mlp_kernel(x_ref, w1_ref, b1_ref, w2_ref, b2_ref, o_ref, *,
                compute_dtype, precision):
    """Fused Linear -> ReLU -> Linear on one batch tile.

    x_ref : (tb, d_in)     original input dtype (cast in-kernel)
    w1_ref: (d_in, d_pad)  f32, lane-padded with zeros past d_out
    b1_ref: (1, d_pad)     f32, zero-padded
    w2_ref: (d_pad, d_pad) f32, zero-padded
    b2_ref: (1, d_out)     f32 (unpadded)
    o_ref : (tb, d_out)    output tile (only useful columns hit HBM)
    """
    x = x_ref[...].astype(compute_dtype)
    w1 = w1_ref[...].astype(compute_dtype)
    h = jnp.dot(x, w1, preferred_element_type=jnp.float32, precision=precision)
    h = jnp.maximum(h + b1_ref[...], 0.0)          # f32 bias + ReLU (v5e-safe)
    w2 = w2_ref[...].astype(compute_dtype)
    y = jnp.dot(h.astype(compute_dtype), w2,
                preferred_element_type=jnp.float32, precision=precision)
    d_out = o_ref.shape[1]
    o_ref[...] = (y[:, :d_out] + b2_ref[...]).astype(o_ref.dtype)


def prepare_params(w1, b1, w2, b2, lane=_LANE):
    """One-time packing: zero-pad the feature axis to a lane-dense width.

    PyTorch stores weights as [out, in]; here weights are already [in, out]
    (pre-transposed).  Padded columns/rows are exactly zero, so they stay zero
    through ReLU and layer 2 and the in-kernel slice is exact.
    """
    d_in, d_out = w1.shape
    d_pad = _round_up(d_out, lane)
    pad = d_pad - d_out
    w1p = jnp.pad(w1.astype(jnp.float32), ((0, 0), (0, pad)))
    b1p = jnp.pad(b1.astype(jnp.float32).reshape(1, d_out), ((0, 0), (0, pad)))
    w2p = jnp.pad(w2.astype(jnp.float32), ((0, pad), (0, pad)))
    b2p = b2.astype(jnp.float32).reshape(1, d_out)
    return w1p, b1p, w2p, b2p


@functools.partial(jax.jit, static_argnames=("block_b", "compute_dtype"))
def nlinear_forward(x, w1p, b1p, w2p, b2, *, block_b=2048,
                    compute_dtype=jnp.bfloat16):
    """Fused forward pass.

    x   : [B, d_in] (any float dtype; cast to compute_dtype inside the kernel)
    w1p : [d_in, d_pad]   b1p: [1, d_pad]   (from prepare_params)
    w2p : [d_pad, d_pad]  b2 : [1, d_out]
    Returns [B, d_out] in x.dtype.
    """
    out_dtype = x.dtype
    B, d_in = x.shape
    d_pad = w1p.shape[1]
    d_out = b2.shape[1]

    # ---- batch tiling: sublane-aligned, >= 2 grid steps when B allows (v7x) ----
    itemsize = jnp.dtype(x.dtype).itemsize
    sub = max(8, 32 // itemsize)                      # 8 for f32, 16 for bf16
    tb = min(block_b, _round_up(max(1, (B + 1) // 2), sub))
    tb = max(sub, _round_up(tb, sub))
    n_blocks = pl.cdiv(B, tb)                         # ragged last block is masked

    precision = (jax.lax.Precision.HIGHEST
                 if jnp.dtype(compute_dtype) == jnp.dtype(jnp.float32)
                 else jax.lax.Precision.DEFAULT)
    kernel = functools.partial(_mlp_kernel, compute_dtype=compute_dtype,
                               precision=precision)

    # ---- honest VMEM budget: double-buffered tiles + resident params + temps ----
    f32 = 4
    x_blk = tb * d_in * itemsize
    o_blk = tb * d_out * jnp.dtype(out_dtype).itemsize
    resident = (d_in * d_pad + d_pad * d_pad + d_pad + d_out) * f32
    temps = 4 * tb * d_pad * f32                      # h (f32+bf16), y, slack
    needed = 2 * (x_blk + o_blk) + 2 * resident + temps
    vmem_limit = int(min(32 * 1024 * 1024, max(2 * needed, 8 * 1024 * 1024)))

    # Cost from the TRUE (unpadded) dims — advisory for the surrounding schedule.
    cost = pl.CostEstimate(
        flops=2 * B * d_in * d_out + 2 * B * d_out * d_out,
        transcendentals=0,
        bytes_accessed=(B * d_in * itemsize
                        + B * d_out * jnp.dtype(out_dtype).itemsize
                        + resident),
    )

    return pl.pallas_call(
        kernel,
        out_shape=jax.ShapeDtypeStruct((B, d_out), out_dtype),
        grid_spec=pltpu.PrefetchScalarGridSpec(
            num_scalar_prefetch=0,
            grid=(n_blocks,),
            in_specs=[
                pl.BlockSpec((tb, d_in), lambda i: (i, 0)),       # x tile (streamed)
                pl.BlockSpec((d_in, d_pad), lambda i: (0, 0)),    # w1 (VMEM-resident)
                pl.BlockSpec((1, d_pad), lambda i: (0, 0)),       # b1 (resident)
                pl.BlockSpec((d_pad, d_pad), lambda i: (0, 0)),   # w2 (resident)
                pl.BlockSpec((1, d_out), lambda i: (0, 0)),       # b2 (resident)
            ],
            out_specs=pl.BlockSpec((tb, d_out), lambda i: (i, 0)),  # only d_out cols
        ),
        compiler_params=pltpu.CompilerParams(
            dimension_semantics=("parallel",),
            vmem_limit_bytes=vmem_limit,
        ),
        cost_estimate=cost,
    )(x, w1p, b1p, w2p, b2)


def init_params(key, input_dim, output_dim=2):
    """Deterministic init mimicking nn.Linear's U(-1/sqrt(fan_in), 1/sqrt(fan_in))."""
    k1, k2, k3, k4 = jax.random.split(key, 4)
    bound1 = 1.0 / jnp.sqrt(input_dim)
    bound2 = 1.0 / jnp.sqrt(output_dim)
    w1 = jax.random.uniform(k1, (input_dim, output_dim), jnp.float32, -bound1, bound1)
    b1 = jax.random.uniform(k2, (1, output_dim), jnp.float32, -bound1, bound1)
    w2 = jax.random.uniform(k3, (output_dim, output_dim), jnp.float32, -bound2, bound2)
    b2 = jax.random.uniform(k4, (1, output_dim), jnp.float32, -bound2, bound2)
    return w1, b1, w2, b2


if __name__ == "__main__":
    key = jax.random.PRNGKey(0)
    kx, kp = jax.random.split(key)

    B, D_IN, D_OUT = 8, 32, 2
    x = jax.random.normal(kx, (B, D_IN), jnp.float32)
    w1, b1, w2, b2 = init_params(kp, D_IN, D_OUT)

    # Pure-JAX reference (same math as the PyTorch forward).
    ref = jnp.maximum(x @ w1 + b1, 0.0) @ w2 + b2

    # One-time param packing (hoisted out of the forward call).
    w1p, b1p, w2p, b2p = prepare_params(w1, b1, w2, b2)

    # f32 compute path (precision=HIGHEST in-kernel): tight-ish tolerance.
    out_f32 = jax.block_until_ready(
        nlinear_forward(x, w1p, b1p, w2p, b2p, compute_dtype=jnp.float32))
    assert out_f32.shape == (B, D_OUT)
    assert jnp.allclose(out_f32, ref, atol=5e-3, rtol=5e-3)

    # bf16 MXU operands + f32 accumulation (default fast path): looser tolerance.
    out_bf16 = jax.block_until_ready(nlinear_forward(x, w1p, b1p, w2p, b2p))
    assert out_bf16.shape == (B, D_OUT)
    assert jnp.allclose(out_bf16, ref, atol=3e-2, rtol=3e-2)

    print("KERNEL_OK")
</pallas_src>

<mosaic_0001>
module attributes {stable_mosaic.version = 11 : i64} {
  func.func @_mlp_kernel(%arg0: i32, %arg1: memref<8x32xf32, #tpu.memory_space<vmem>>, %arg2: memref<32x128xf32, #tpu.memory_space<vmem>>, %arg3: memref<1x128xf32, #tpu.memory_space<vmem>>, %arg4: memref<128x128xf32, #tpu.memory_space<vmem>>, %arg5: memref<1x2xf32, #tpu.memory_space<vmem>>, %arg6: memref<8x2xf32, #tpu.memory_space<vmem>>) attributes {dimension_semantics = [#tpu.dimension_semantics<parallel>], iteration_bounds = array<i64: 1>, scalar_prefetch = 0 : i64, scratch_operands = 0 : i64, tpu.core_type = #tpu.core_type<tc>, window_params = [{transform_indices = @transform_0, window_bounds = array<i64: 8, 32>}, {pipeline_mode = #tpu.pipeline_mode<synchronous>, transform_indices = @transform_1, window_bounds = array<i64: 32, 128>}, {pipeline_mode = #tpu.pipeline_mode<synchronous>, transform_indices = @transform_2, window_bounds = array<i64: 1, 128>}, {pipeline_mode = #tpu.pipeline_mode<synchronous>, transform_indices = @transform_3, window_bounds = array<i64: 128, 128>}, {pipeline_mode = #tpu.pipeline_mode<synchronous>, transform_indices = @transform_4, window_bounds = array<i64: 1, 2>}, {transform_indices = @transform_5, window_bounds = array<i64: 8, 2>}]} {
    %c0 = arith.constant 0 : index
    %c0_0 = arith.constant 0 : index
    %0 = vector.load %arg1[%c0, %c0_0] : memref<8x32xf32, #tpu.memory_space<vmem>>, vector<8x32xf32>
    %c0_1 = arith.constant 0 : index
    %c0_2 = arith.constant 0 : index
    %1 = vector.load %arg2[%c0_1, %c0_2] : memref<32x128xf32, #tpu.memory_space<vmem>>, vector<32x128xf32>
    %cst = arith.constant dense<0.000000e+00> : vector<8x128xf32>
    %2 = tpu.matmul %0, %1, %cst {dimension_numbers = #tpu.dot_dimension_numbers<[1], [0], [0], [1], [0, 0, 1, 1], [], []>, precision = #tpu.contract_precision<fp32>} : vector<8x32xf32>, vector<32x128xf32>, vector<8x128xf32> -> vector<8x128xf32>
    %c0_3 = arith.constant 0 : index
    %c0_4 = arith.constant 0 : index
    %3 = vector.load %arg3[%c0_3, %c0_4] : memref<1x128xf32, #tpu.memory_space<vmem>>, vector<1x128xf32>
    %4 = vector.broadcast %3 : vector<1x128xf32> to vector<8x128xf32>
    %5 = arith.addf %2, %4 : vector<8x128xf32>
    %cst_5 = arith.constant 0.000000e+00 : f32
    %6 = vector.broadcast %cst_5 : f32 to vector<8x128xf32>
    %7 = arith.maximumf %5, %6 : vector<8x128xf32>
    %c0_6 = arith.constant 0 : index
    %c0_7 = arith.constant 0 : index
    %8 = vector.load %arg4[%c0_6, %c0_7] : memref<128x128xf32, #tpu.memory_space<vmem>>, vector<128x128xf32>
    %cst_8 = arith.constant dense<0.000000e+00> : vector<8x128xf32>
    %9 = tpu.matmul %7, %8, %cst_8 {dimension_numbers = #tpu.dot_dimension_numbers<[1], [0], [0], [1], [0, 0, 1, 1], [], []>, precision = #tpu.contract_precision<fp32>} : vector<8x128xf32>, vector<128x128xf32>, vector<8x128xf32> -> vector<8x128xf32>
    %10 = vector.extract_strided_slice %9 {offsets = [0, 0], sizes = [8, 2], strides = [1, 1]} : vector<8x128xf32> to vector<8x2xf32>
    %c0_9 = arith.constant 0 : index
    %c0_10 = arith.constant 0 : index
    %11 = vector.load %arg5[%c0_9, %c0_10] : memref<1x2xf32, #tpu.memory_space<vmem>>, vector<1x2xf32>
    %12 = vector.broadcast %11 : vector<1x2xf32> to vector<8x2xf32>
    %13 = arith.addf %10, %12 : vector<8x2xf32>
    %c0_11 = arith.constant 0 : index
    %c0_12 = arith.constant 0 : index
    %14 = vector.load %arg6[%c0_11, %c0_12] : memref<8x2xf32, #tpu.memory_space<vmem>>, vector<8x2xf32>
    tpu.vector_store %arg6[%c0_11, %c0_12], %13 {strides = array<i32>} : memref<8x2xf32, #tpu.memory_space<vmem>>, vector<8x2xf32>,
    return
  }
  func.func @transform_0(%arg0: i32) -> (i32, i32) {
    %c0_i32 = arith.constant 0 : i32
    %c0_i32_0 = arith.constant 0 : i32
    return %arg0, %c0_i32 : i32, i32
  }
  func.func @transform_1(%arg0: i32) -> (i32, i32) {
    %c0_i32 = arith.constant 0 : i32
    %c0_i32_0 = arith.constant 0 : i32
    %c0_i32_1 = arith.constant 0 : i32
    return %c0_i32, %c0_i32_0 : i32, i32
  }
  func.func @transform_2(%arg0: i32) -> (i32, i32) {
    %c0_i32 = arith.constant 0 : i32
    %c0_i32_0 = arith.constant 0 : i32
    %c0_i32_1 = arith.constant 0 : i32
    return %c0_i32, %c0_i32_0 : i32, i32
  }
  func.func @transform_3(%arg0: i32) -> (i32, i32) {
    %c0_i32 = arith.constant 0 : i32
    %c0_i32_0 = arith.constant 0 : i32
    %c0_i32_1 = arith.constant 0 : i32
    return %c0_i32, %c0_i32_0 : i32, i32
  }
  func.func @transform_4(%arg0: i32) -> (i32, i32) {
    %c0_i32 = arith.constant 0 : i32
    %c0_i32_0 = arith.constant 0 : i32
    %c0_i32_1 = arith.constant 0 : i32
    return %c0_i32, %c0_i32_0 : i32, i32
  }
  func.func @transform_5(%arg0: i32) -> (i32, i32) {
    %c0_i32 = arith.constant 0 : i32
    %c0_i32_0 = arith.constant 0 : i32
    return %arg0, %c0_i32 : i32, i32
  }
}

</mosaic_0001>

<bundles_post_ra>
// kernel: nlinear_forward.1
= control target key start
LH: loop header
LB: loop body
LE: loop exit
PB: predicated region body
PF: predicated region fallthrough
CT: control target
= control target key end

     0   :  { %10 = vsyncpa [#allocation3], 0  ;;  %s2210_s0 = inlined_call_operand.hbm [shape: f32[8,32], index: 0, kind: input, shape index: {}]   ;;  %s2211_s1 = inlined_call_operand.hbm [shape: f32[32,128], index: 1, kind: input, shape index: {}]   ;;  %s2212_s2 = inlined_call_operand.vmem [shape: f32[1,128], index: 2, kind: input, shape index: {}]   ;;  %s2213_s3 = inlined_call_operand.hbm [shape: f32[128,128], index: 3, kind: input, shape index: {}]   ;;  %s2214_s4 = inlined_call_operand.vmem [shape: f32[1,2], index: 4, kind: input, shape index: {}]   ;;  %s2215_s5 = inlined_call_operand.vmem [shape: f32[8,2], index: 5, kind: output, shape index: {}]  }
   0x1   :  { %11 = vsyncpa [#allocation5], 0  ;;  %s1715_s18 = smov [#allocation4]  }
   0x2   :  { %s27_s19 = sshll.u32 %s1715_s18, 4  ;;  %s28_s19 = int_to_ptr.vmem [resolvable:$true] %s27_s19 }
   0x3   :  { %s1659_s20 = scalar_lea.vmem %s28_s19, 512  ;;  %p1664_p1 = scmp.lt.s32.totalorder %s28_s19, %s28_s19 }
   0x4   :  { %p1660_p0 = scmp.ne.s32.totalorder %s28_s19, %s1659_s20  ;;  %p1665_p2 = scmp.lt.s32.totalorder %s1659_s20, %s1659_s20 }
   0x6   :  { %p1666_p3 = por %p1665_p2, %p1664_p1 }
   0x8   :  { %p1667_p4 = pnand %p1666_p3, %p1660_p0 }
   0xa   :  { %1670 = shalt.err (!%p1667_p4)
}
   0xb   :  { %s1716_s21 = smov 128   ;;  %s1717_s22 = smov 8  }
   0xc   :  { %33 = dma.hbm_to_vmem [thread:$0]  %s2211_s1, 512, %s28_s19, [#allocation5], %s1716_s21, %s1716_s21, %s1717_s22  }
   0xd   :  { %s1718_s25 = smov [#allocation2]   ;;  %s1719_s27 = smov [#allocation6]  }
   0xe   :  { %s18_s26 = sshll.u32 %s1718_s25, 4  ;;  %s41_s28 = sshll.u32 %s1719_s27, 4  ;;  %s19_s26 = int_to_ptr.vmem [resolvable:$true] %s18_s26  ;;  %s42_s28 = int_to_ptr.vmem [resolvable:$true] %s41_s28 }
   0xf   :  { %s1679_s29 = scalar_lea.vmem %s19_s26, 128  ;;  %p1684_p6 = scmp.lt.s32.totalorder %s19_s26, %s19_s26 }
  0x10   :  { %p1680_p5 = scmp.ne.s32.totalorder %s19_s26, %s1679_s29  ;;  %p1685_p7 = scmp.lt.s32.totalorder %s1679_s29, %s1679_s29 }
  0x12   :  { %p1686_p8 = por %p1685_p7, %p1684_p6 }
  0x14   :  { %p1687_p9 = pnand %p1686_p8, %p1680_p5 }
  0x16   :  { %1690 = shalt.err (!%p1687_p9)
}
  0x17   :  { %21 = dma.hbm_to_vmem [thread:$0]  %s2210_s0, 128, %s19_s26, [#allocation3]  }
  0x18   :  { %s1699_s7 = scalar_lea.vmem %s42_s28, 2048  ;;  %p1704_p11 = scmp.lt.s32.totalorder %s42_s28, %s42_s28 }
  0x19   :  { %p1700_p10 = scmp.ne.s32.totalorder %s42_s28, %s1699_s7  ;;  %p1705_p12 = scmp.lt.s32.totalorder %s1699_s7, %s1699_s7 }
  0x1b   :  { %p1706_p13 = por %p1705_p12, %p1704_p11 }
  0x1d   :  { %p1707_p0 = pnand %p1706_p13, %p1700_p10 }
  0x1f   :  { %1710 = shalt.err (!%p1707_p0)
}
  0x20   :  { %47 = dma.hbm_to_vmem [thread:$0]  %s2213_s3, 2048, %s42_s28, [#allocation5], %s1716_s21, %s1716_s21, %s1717_s22  }
  0x21   :  { %1711 = dma.done.wait [#allocation3], 128  }
  0x22   :  { %1712 = vsyncadd [#allocation3], 4294967168 }
  0x23   :  { %1713 = dma.done.wait [#allocation5], 2560  }
  0x24   :  { %1714 = vsyncadd [#allocation5], 4294964736  ;;  %v1720_v0 = vmov 0.0   ;;  %vm1721_vm0 = vmmov 0   ;;  %vm71_vm1 = vcmask 261120   ;;  %v63_v1 = vld [vmem:[#allocation4 + $0x18] sm:$0xff] }
  0x25   :  { %1368 = vmatprep.subr.mxu0 %v1720_v0  ;;  %1379 = vmatprep.subr.mxu1 %v1720_v0  ;;  %v62_v2 = vld [vmem:[#allocation4 + $0x10] sm:$0xff]  ;;  %v61_v3 = vld [vmem:[#allocation4 + $0x8] sm:$0xff]  ;;  %v1767_v4 = vand.u32 4294901760, %v63_v1  ;;  %v60_v7 = vld [vmem:[#allocation4] sm:$0xff]  ;;  %vm1226_vm2 = vcmask 15360  }
  0x26   :  { %1376 = vmatprep.mubr.msk.f32.mxu0 %vm1721_vm0, %v1720_v0  ;;  %1387 = vmatprep.mubr.msk.f32.mxu1 %vm1721_vm0, %v1720_v0  ;;  %v1769_v5 = vand.u32 4294901760, %v62_v2  ;;  %v1771_v6 = vand.u32 4294901760, %v61_v3  ;;  %v59_v8 = vld [vmem:[#allocation2] sm:$0xff]  ;;  %v1773_v9 = vand.u32 4294901760, %v60_v7  ;;  %v575_v33 = vld [vmem:[#allocation6 + $0x70] sm:$0xff]  ;;  %v574_v35 = vld [vmem:[#allocation6 + $0x68] sm:$0xff] }
  0x27   :  { %v73_v10 = vsel %vm71_vm1, %v59_v8, 0  ;;  %1369 = vmatpush3.msra.mxu0 %v1767_v4  ;;  %v180_v11 = vsub.f32 %v63_v1, %v1767_v4  ;;  %v576_v32 = vld [vmem:[#allocation6 + $0x78] sm:$0xff]  ;;  %v1818_v36 = vand.u32 4294901760, %v575_v33  ;;  %v1826_v38 = vand.u32 4294901760, %v574_v35  ;;  %v573_v50 = vld [vmem:[#allocation6 + $0x60] sm:$0xff]  ;;  %v571_v55 = vld [vmem:[#allocation6 + $0x50] sm:$0xff] }
  0x28   :  { %v1777_v12 = vand.u32 4294901760, %v73_v10  ;;  %v187_v13 = vsub.f32 %v62_v2, %v1769_v5  ;;  %v1781_v14 = vsub.f32 %v61_v3, %v1771_v6  ;;  %1370 = vmatprep.subr.mxu0 %v1720_v0  ;;  %v1785_v15 = vsub.f32 %v60_v7, %v1773_v9  ;;  %v572_v52 = vld [vmem:[#allocation6 + $0x58] sm:$0xff]  ;;  %v570_v59 = vld [vmem:[#allocation6 + $0x48] sm:$0xff]  ;;  %v569_v1 = vld [vmem:[#allocation6 + $0x40] sm:$0xff] }
  0x29   :  { %1371 = vmatpush3.msra.mxu0 %v1769_v5  ;;  %v181_v16 = vand.u32 4294901760, %v180_v11  ;;  %v1811_v34 = vand.u32 4294901760, %v576_v32  ;;  %v1832_v39 = vsub.f32 %v575_v33, %v1818_v36  ;;  %v1841_v41 = vsub.f32 %v574_v35, %v1826_v38  ;;  %v568_v7 = vld [vmem:[#allocation6 + $0x38] sm:$0xff] }
  0x2a   :  { %v1789_v17 = vsub.f32 %v73_v10, %v1777_v12  ;;  %v188_v18 = vand.u32 4294901760, %v187_v13  ;;  %v195_v19 = vand.u32 4294901760, %v1781_v14  ;;  %1372 = vmatprep.subr.mxu0 %v1720_v0  ;;  %v202_v20 = vand.u32 4294901760, %v1785_v15 }
  0x2b   :  { %1373 = vmatpush3.msra.mxu0 %v1771_v6  ;;  %v182_v21 = vsub.f32 %v180_v11, %v181_v16  ;;  %v1824_v37 = vsub.f32 %v576_v32, %v1811_v34  ;;  %v678_v42 = vand.u32 4294901760, %v1832_v39  ;;  %v685_v44 = vand.u32 4294901760, %v1841_v41 }
  0x2c   :  { %v146_v22 = vand.u32 4294901760, %v1789_v17  ;;  %v189_v23 = vsub.f32 %v187_v13, %v188_v18  ;;  %v196_v24 = vsub.f32 %v1781_v14, %v195_v19  ;;  %1374 = vmatprep.subr.mxu0 %v1720_v0  ;;  %v203_v28 = vsub.f32 %v1785_v15, %v202_v20 }
  0x2d   :  { %1375 = vmatpush3.msra.mxu0 %v1773_v9  ;;  %v183_v25 = vand.u32 4294901760, %v182_v21  ;;  %v671_v40 = vand.u32 4294901760, %v1824_v37  ;;  %v679_v45 = vsub.f32 %v1832_v39, %v678_v42  ;;  %v686_v47 = vsub.f32 %v1841_v41, %v685_v44 }
  0x2e   :  { %v147_v26 = vsub.f32 %v1789_v17, %v146_v22  ;;  %v190_v27 = vand.u32 4294901760, %v189_v23  ;;  %1390 = vmatprep.subr.mxu0 %v1720_v0  ;;  %v197_v30 = vand.u32 4294901760, %v196_v24  ;;  %v204_v31 = vand.u32 4294901760, %v203_v28 }
  0x2f   :  { %1380 = vmatpush3.msra.mxu1 %v183_v25  ;;  %v672_v43 = vsub.f32 %v1824_v37, %v671_v40  ;;  %v680_v48 = vand.u32 4294901760, %v679_v45  ;;  %v687_v49 = vand.u32 4294901760, %v686_v47  ;;  %v1884_v51 = vand.u32 4294901760, %v573_v50  ;;  %v565_v25 = vld [vmem:[#allocation6 + $0x20] sm:$0xff] }
  0x30   :  { %v148_v29 = vand.u32 4294901760, %v147_v26  ;;  %1381 = vmatprep.subr.mxu1 %v1720_v0  ;;  %v1889_v54 = vand.u32 4294901760, %v572_v52  ;;  %v1897_v58 = vand.u32 4294901760, %v571_v55  ;;  %v1908_v63 = vand.u32 4294901760, %v570_v59 }
  0x31   :  { %1382 = vmatpush3.msra.mxu1 %v190_v27  ;;  %v673_v46 = vand.u32 4294901760, %v672_v43  ;;  %v1887_v53 = vsub.f32 %v573_v50, %v1884_v51 }
  0x32   :  { %1377 = vmatmul.mubr.f32.vlgmr.msra.gmra.mxu0 %v148_v29  ;;  %1383 = vmatprep.subr.mxu1 %v1720_v0  ;;  %v1895_v57 = vsub.f32 %v572_v52, %v1889_v54  ;;  %v1906_v62 = vsub.f32 %v571_v55, %v1897_v58  ;;  %v1965_v29 = vand.u32 4294901760, %v565_v25  ;;  %v562_v55 = vld [vmem:[#allocation6 + $0x8] sm:$0xff] }
  0x33   :  { %1391 = vmatpush3.msra.mxu0 %v180_v11  ;;  %1384 = vmatpush3.msra.mxu1 %v197_v30  ;;  %v692_v56 = vand.u32 4294901760, %v1887_v53  ;;  %v1927_v11 = vand.u32 4294901760, %v568_v7 }
  0x34   :  { %1392 = vmatprep.subr.mxu0 %v1720_v0  ;;  %1385 = vmatprep.subr.mxu1 %v1720_v0  ;;  %v699_v61 = vand.u32 4294901760, %v1895_v57  ;;  %v1975_v43 = vsub.f32 %v565_v25, %v1965_v29 }
  0x35   :  { %1393 = vmatpush3.msra.mxu0 %v187_v13  ;;  %1386 = vmatpush3.msra.mxu1 %v204_v31  ;;  %v693_v60 = vsub.f32 %v1887_v53, %v692_v56  ;;  %v567_v13 = vld [vmem:[#allocation6 + $0x30] sm:$0xff]  ;;  %v564_v31 = vld [vmem:[#allocation6 + $0x18] sm:$0xff] }
  0x36   :  { %1394 = vmatprep.subr.mxu0 %v1720_v0  ;;  %1388 = vmatmul.mubr.f32.vlgmr.msra.gmra.mxu1 %v1777_v12  ;;  %v700_v3 = vsub.f32 %v1895_v57, %v699_v61  ;;  %v1978_v45 = vand.u32 4294901760, %v564_v31 }
  0x37   :  { %1395 = vmatpush3.msra.mxu0 %v1781_v14  ;;  %1401 = vmatprep.subr.mxu1 %v1720_v0  ;;  %v694_v2 = vand.u32 4294901760, %v693_v60 }
  0x38   :  { %1396 = vmatprep.subr.mxu0 %v1720_v0  ;;  %1402 = vmatpush3.msra.mxu1 %v1767_v4  ;;  %v701_v8 = vand.u32 4294901760, %v700_v3  ;;  %v1990_v52 = vsub.f32 %v564_v31, %v1978_v45 }
  0x39   :  { %1397 = vmatpush3.msra.mxu0 %v1785_v15  ;;  %1398 = vmatprep.mubr.msk.f32.mxu0 %vm1721_vm0, %v1720_v0 }
  0x3a   :  { %1403 = vmatprep.subr.mxu1 %v1720_v0  ;;  %1412 = vmatprep.subr.mxu0 %v1720_v0  ;;  %v2219_v3 = vand.u32 4294901760, %v1990_v52 }
  0x3b   :  { %1399 = vmatmul.mubr.f32.vlgmr.msra.gmra.mxu0 %v1789_v17  ;;  %1404 = vmatpush3.msra.mxu1 %v1769_v5  ;;  %v1940_v17 = vand.u32 4294901760, %v567_v13 }
  0x3c   :  { %1413 = vmatpush3.msra.mxu0 %v181_v16  ;;  %1405 = vmatprep.subr.mxu1 %v1720_v0  ;;  %v1938_v16 = vsub.f32 %v568_v7, %v1927_v11  ;;  %v561_v7 = vld [vmem:[#allocation6] sm:$0xff] }
  0x3d   :  { %1414 = vmatprep.subr.mxu0 %v1720_v0  ;;  %1406 = vmatpush3.msra.mxu1 %v1771_v6 }
  0x3e   :  { %1415 = vmatpush3.msra.mxu0 %v188_v18  ;;  %1407 = vmatprep.subr.mxu1 %v1720_v0  ;;  %v727_v21 = vand.u32 4294901760, %v1938_v16 }
  0x3f   :  { %1416 = vmatprep.subr.mxu0 %v1720_v0  ;;  %1408 = vmatpush3.msra.mxu1 %v1773_v9 }
  0x40   :  { %1409 = vmatprep.mubr.msk.f32.mxu1 %vm1721_vm0, %v1720_v0  ;;  %1417 = vmatpush3.msra.mxu0 %v195_v19  ;;  %v566_v19 = vld [vmem:[#allocation6 + $0x28] sm:$0xff]  ;;  %v728_v26 = vsub.f32 %v1938_v16, %v727_v21 }
  0x41   :  { %1410 = vmatmul.mubr.f32.vlgmr.msra.gmra.mxu1 %v146_v22  ;;  %1418 = vmatprep.subr.mxu0 %v1720_v0  ;;  %v1948_v22 = vsub.f32 %v567_v13, %v1940_v17  ;;  %v1950_v23 = vand.u32 4294901760, %v566_v19 }
  0x42   :  { %1423 = vmatprep.subr.mxu1 %v1720_v0  ;;  %1419 = vmatpush3.msra.mxu0 %v202_v20  ;;  %v729_v32 = vand.u32 4294901760, %v728_v26 }
  0x43   :  { %1420 = vmatprep.mubr.msk.f32.mxu0 %vm1721_vm0, %v1720_v0  ;;  %1424 = vmatpush3.msra.mxu1 %v1767_v4  ;;  %v706_v4 = vand.u32 4294901760, %v1906_v62  ;;  %v734_v27 = vand.u32 4294901760, %v1948_v22  ;;  %v1963_v28 = vsub.f32 %v566_v19, %v1950_v23 }
  0x44   :  { %1421 = vmatmul.mubr.f32.vlgmr.msra.gmra.mxu0 %v1777_v12  ;;  %1425 = vmatprep.subr.mxu1 %v1720_v0 }
  0x45   :  { %1431 = vmatprep.mubr.msk.f32.mxu1 %vm1721_vm0, %v1720_v0  ;;  %1426 = vmatpush3.msra.mxu1 %v1769_v5  ;;  %v1917_v5 = vsub.f32 %v570_v59, %v1908_v63  ;;  %v735_v33 = vsub.f32 %v1948_v22, %v734_v27  ;;  %v2221_v35 = vand.u32 4294901760, %v1963_v28 }
  0x46   :  { %1434 = vmatprep.subr.mxu0 %v1720_v0  ;;  %1427 = vmatprep.subr.mxu1 %v1720_v0 }
  0x47   :  { %1435 = vmatpush3.msra.mxu0 %v1811_v34  ;;  %1428 = vmatpush3.msra.mxu1 %v1771_v6  ;;  %v1920_v6 = vand.u32 4294901760, %v569_v1  ;;  %v713_v10 = vand.u32 4294901760, %v1917_v5  ;;  %v736_v47 = vand.u32 4294901760, %v735_v33 }
  0x48   :  { %1436 = vmatprep.subr.mxu0 %v1720_v0  ;;  %1429 = vmatprep.subr.mxu1 %v1720_v0 }
  0x49   :  { %1437 = vmatpush3.msra.mxu0 %v1818_v36  ;;  %1430 = vmatpush3.msra.mxu1 %v1773_v9  ;;  %v707_v9 = vsub.f32 %v1906_v62, %v706_v4  ;;  %v714_v15 = vsub.f32 %v1917_v5, %v713_v10 }
  0x4a   :  { %1438 = vmatprep.subr.mxu0 %v1720_v0  ;;  %1432 = vmatmul.mubr.f32.vlgmr.msra.gmra.mxu1 %v1777_v12  ;;  %v1931_v12 = vsub.f32 %v569_v1, %v1920_v6 }
  0x4b   :  { %1469 = vmatprep.subr.mxu1 %v1720_v0  ;;  %1439 = vmatpush3.msra.mxu0 %v1826_v38  ;;  %v708_v14 = vand.u32 4294901760, %v707_v9  ;;  %v715_v20 = vand.u32 4294901760, %v714_v15  ;;  %v756_v15 = vsub.f32 %v1990_v52, %v2219_v3 }
  0x4c   :  { %1470 = vmatpush3.msra.mxu1 %v673_v46  ;;  %1440 = vmatprep.subr.mxu0 %v1720_v0  ;;  %v720_v18 = vand.u32 4294901760, %v1931_v12  ;;  %v563_v46 = vld [vmem:[#allocation6 + $0x10] sm:$0xff] }
  0x4d   :  { %1471 = vmatprep.subr.mxu1 %v1720_v0  ;;  %1501 = vmatprep.mubr.msk.f32.mxu1 %vm1721_vm0, %v1720_v0  ;;  %v1986_v50 = vand.u32 4294901760, %v563_v46  ;;  %v757_v25 = vand.u32 4294901760, %v756_v15 }
  0x4e   :  { %1472 = vmatpush3.msra.mxu1 %v680_v48  ;;  %1466 = vmatprep.mubr.msk.f32.mxu0 %vm1721_vm0, %v1720_v0  ;;  %v721_v24 = vsub.f32 %v1931_v12, %v720_v18  ;;  %v742_v48 = vsub.f32 %v1963_v28, %v2221_v35 }
  0x4f   :  { %1473 = vmatprep.subr.mxu1 %v1720_v0  ;;  %1441 = vmatpush3.msra.mxu0 %v1884_v51  ;;  %v1998_v1 = vsub.f32 %v563_v46, %v1986_v50 }
  0x50   :  { %1474 = vmatpush3.msra.mxu1 %v687_v49  ;;  %1442 = vmatprep.subr.mxu0 %v1720_v0  ;;  %v722_v30 = vand.u32 4294901760, %v721_v24  ;;  %v2220_v49 = vand.u32 4294901760, %v1975_v43  ;;  %v743_v59 = vand.u32 4294901760, %v742_v48 }
  0x51   :  { %1475 = vmatprep.subr.mxu1 %v1720_v0  ;;  %1443 = vmatpush3.msra.mxu0 %v1889_v54  ;;  %v2218_v9 = vand.u32 4294901760, %v1998_v1 }
  0x52   :  { %1444 = vmatprep.subr.mxu0 %v1720_v0  ;;  %1476 = vmatpush3.msra.mxu1 %v694_v2  ;;  %v749_v60 = vsub.f32 %v1975_v43, %v2220_v49  ;;  %v2000_v2 = vand.u32 4294901760, %v562_v55 }
  0x53   :  { %1445 = vmatpush3.msra.mxu0 %v1897_v58  ;;  %1477 = vmatprep.subr.mxu1 %v1720_v0  ;;  %v763_v19 = vsub.f32 %v1998_v1, %v2218_v9 }
  0x54   :  { %1446 = vmatprep.subr.mxu0 %v1720_v0  ;;  %1478 = vmatpush3.msra.mxu1 %v701_v8  ;;  %v750_v8 = vand.u32 4294901760, %v749_v60  ;;  %v2008_v13 = vsub.f32 %v562_v55, %v2000_v2 }
  0x55   :  { %1447 = vmatpush3.msra.mxu0 %v1908_v63  ;;  %1479 = vmatprep.subr.mxu1 %v1720_v0  ;;  %v764_v26 = vand.u32 4294901760, %v763_v19 }
  0x56   :  { %1448 = vmatprep.subr.mxu0 %v1720_v0  ;;  %1480 = vmatpush3.msra.mxu1 %v708_v14  ;;  %v2010_v14 = vand.u32 4294901760, %v561_v7 }
  0x57   :  { %1449 = vmatpush3.msra.mxu0 %v1920_v6  ;;  %1481 = vmatprep.subr.mxu1 %v1720_v0 }
  0x58   :  { %1450 = vmatprep.subr.mxu0 %v1720_v0  ;;  %1482 = vmatpush3.msra.mxu1 %v715_v20  ;;  %v2217_v20 = vand.u32 4294901760, %v2008_v13  ;;  %v2023_v24 = vsub.f32 %v561_v7, %v2010_v14 }
  0x59   :  { %1451 = vmatpush3.msra.mxu0 %v1927_v11  ;;  %1483 = vmatprep.subr.mxu1 %v1720_v0 }
  0x5a   :  { %1452 = vmatprep.subr.mxu0 %v1720_v0  ;;  %1484 = vmatpush3.msra.mxu1 %v722_v30  ;;  %v770_v30 = vsub.f32 %v2008_v13, %v2217_v20  ;;  %v2216_v31 = vand.u32 4294901760, %v2023_v24 }
  0x5b   :  { %1453 = vmatpush3.msra.mxu0 %v1940_v17  ;;  %1485 = vmatprep.subr.mxu1 %v1720_v0 }
  0x5c   :  { %1454 = vmatprep.subr.mxu0 %v1720_v0  ;;  %1486 = vmatpush3.msra.mxu1 %v729_v32  ;;  %v771_v32 = vand.u32 4294901760, %v770_v30  ;;  %v777_v33 = vsub.f32 %v2023_v24, %v2216_v31 }
  0x5d   :  { %1455 = vmatpush3.msra.mxu0 %v1950_v23  ;;  %1487 = vmatprep.subr.mxu1 %v1720_v0 }
  0x5e   :  { %1456 = vmatprep.subr.mxu0 %v1720_v0  ;;  %1488 = vmatpush3.msra.mxu1 %v736_v47  ;;  %v778_v46 = vand.u32 4294901760, %v777_v33 }
  0x5f   :  { %1457 = vmatpush3.msra.mxu0 %v1965_v29  ;;  %1489 = vmatprep.subr.mxu1 %v1720_v0 }
  0x60   :  { %1458 = vmatprep.subr.mxu0 %v1720_v0  ;;  %1490 = vmatpush3.msra.mxu1 %v743_v59  ;;  %v1234_v59 = vld [vmem:[%s2212_s2] ss:$0 sm:$0xff] }
  0x61   :  { %1459 = vmatpush3.msra.mxu0 %v1978_v45  ;;  %1491 = vmatprep.subr.mxu1 %v1720_v0 }
  0x62   :  { %1460 = vmatprep.subr.mxu0 %v1720_v0  ;;  %1492 = vmatpush3.msra.mxu1 %v750_v8 }
  0x63   :  { %1461 = vmatpush3.msra.mxu0 %v1986_v50  ;;  %1493 = vmatprep.subr.mxu1 %v1720_v0 }
  0x64   :  { %1462 = vmatprep.subr.mxu0 %v1720_v0  ;;  %1494 = vmatpush3.msra.mxu1 %v757_v25 }
  0x65   :  { %1463 = vmatpush3.msra.mxu0 %v2000_v2  ;;  %1495 = vmatprep.subr.mxu1 %v1720_v0 }
  0x66   :  { %1464 = vmatprep.subr.mxu0 %v1720_v0  ;;  %1496 = vmatpush3.msra.mxu1 %v764_v26 }
  0x67   :  { %1465 = vmatpush3.msra.mxu0 %v2010_v14  ;;  %1497 = vmatprep.subr.mxu1 %v1720_v0 }
  0x68   :  { %1504 = vmatprep.subr.mxu0 %v1720_v0  ;;  %1498 = vmatpush3.msra.mxu1 %v771_v32 }
  0x69   :  { %1499 = vmatprep.subr.mxu1 %v1720_v0 }
  0x6a   :  { %1500 = vmatpush3.msra.mxu1 %v778_v46 }
  0x6b   :  { %1539 = vmatprep.subr.mxu1 %v1720_v0 }
  0xf2   :  { %v150_v47 = vpop.f32.mrf.mxu0 }
  0xf3   :  { %v151_v8 = vadd.f32 %v1234_v59, %v150_v47 }
  0xf4   :  { %v1378_v48 = vpop.f32.mrf.mxu0 }
  0xf6   :  { %v241_v55 = vpop.f32.mrf.mxu1 }
  0xf7   :  { %v242_v19 = vadd.f32 %v241_v55, %v151_v8 }
  0xf8   :  { %v1389_v60 = vpop.f32.mrf.mxu1 }
  0xfb   :  { %v321_v7 = vpop.f32.mrf.mxu0 }
  0xfc   :  { %v322_v30 = vadd.f32 %v321_v7, %v242_v19 }
  0xfd   :  { %v1400_v15 = vpop.f32.mrf.mxu0 }
 0x101   :  { %v398_v25 = vpop.f32.mrf.mxu1 }
 0x102   :  { %v399_v33 = vadd.f32 %v398_v25, %v322_v30 }
 0x103   :  { %v1411_v26 = vpop.f32.mrf.mxu1 }
 0x104   :  { %v481_v32 = vpop.f32.mrf.mxu0 }
 0x105   :  { %v482_v31 = vadd.f32 %v481_v32, %v399_v33 }
 0x106   :  { %v1422_v46 = vpop.f32.mrf.mxu0 }
 0x10a   :  { %v556_v20 = vpop.f32.mrf.mxu1 }
 0x10b   :  { %v557_v9 = vadd.f32 %v556_v20, %v482_v31 }
 0x10c   :  { %v1433_v48 = vpop.f32.mrf.mxu1 }
 0x10d   :  { %v560_v3 = vmax.f32 %v557_v9, 0.0 }
 0x10f   :  { %v2043_v49 = vand.u32 4294901760, %v560_v3 }
 0x111   :  { %v2046_v35 = vsub.f32 %v560_v3, %v2043_v49  ;;  %1502 = vmatmul.mubr.f32.vlgmr.msra.gmra.mxu1 %v2043_v49 }
 0x112   :  { %1540 = vmatpush3.msra.mxu1 %v1811_v34  ;;  %1571 = vmatprep.mubr.msk.f32.mxu1 %vm1721_vm0, %v1720_v0 }
 0x113   :  { %v660_v47 = vand.u32 4294901760, %v2046_v35  ;;  %1541 = vmatprep.subr.mxu1 %v1720_v0 }
 0x114   :  { %1542 = vmatpush3.msra.mxu1 %v1818_v36 }
 0x115   :  { %v661_v9 = vsub.f32 %v2046_v35, %v660_v47  ;;  %1543 = vmatprep.subr.mxu1 %v1720_v0 }
 0x116   :  { %1544 = vmatpush3.msra.mxu1 %v1826_v38 }
 0x117   :  { %1545 = vmatprep.subr.mxu1 %v1720_v0  ;;  %v662_v3 = vand.u32 4294901760, %v661_v9 }
 0x118   :  { %1546 = vmatpush3.msra.mxu1 %v1884_v51 }
 0x119   :  { %1547 = vmatprep.subr.mxu1 %v1720_v0  ;;  %1467 = vmatmul.mubr.f32.vlgmr.msra.gmra.mxu0 %v662_v3 }
 0x11a   :  { %1505 = vmatpush3.msra.mxu0 %v1824_v37  ;;  %1548 = vmatpush3.msra.mxu1 %v1889_v54  ;;  %v2224_v37 = vand.u32 4294901760, %v1990_v52 }
 0x11b   :  { %1506 = vmatprep.subr.mxu0 %v1720_v0  ;;  %1549 = vmatprep.subr.mxu1 %v1720_v0 }
 0x11c   :  { %1507 = vmatpush3.msra.mxu0 %v1832_v39  ;;  %1550 = vmatpush3.msra.mxu1 %v1897_v58  ;;  %v2226_v39 = vand.u32 4294901760, %v2008_v13 }
 0x11d   :  { %1508 = vmatprep.subr.mxu0 %v1720_v0  ;;  %1551 = vmatprep.subr.mxu1 %v1720_v0 }
 0x11e   :  { %1509 = vmatpush3.msra.mxu0 %v1841_v41  ;;  %1552 = vmatpush3.msra.mxu1 %v1908_v63 }
 0x11f   :  { %1510 = vmatprep.subr.mxu0 %v1720_v0  ;;  %1553 = vmatprep.subr.mxu1 %v1720_v0 }
 0x120   :  { %1511 = vmatpush3.msra.mxu0 %v1887_v53  ;;  %1554 = vmatpush3.msra.mxu1 %v1920_v6 }
 0x121   :  { %1512 = vmatprep.subr.mxu0 %v1720_v0  ;;  %1555 = vmatprep.subr.mxu1 %v1720_v0 }
 0x122   :  { %1513 = vmatpush3.msra.mxu0 %v1895_v57  ;;  %1556 = vmatpush3.msra.mxu1 %v1927_v11 }
 0x123   :  { %1514 = vmatprep.subr.mxu0 %v1720_v0  ;;  %1557 = vmatprep.subr.mxu1 %v1720_v0 }
 0x124   :  { %1515 = vmatpush3.msra.mxu0 %v1906_v62  ;;  %1558 = vmatpush3.msra.mxu1 %v1940_v17 }
 0x125   :  { %1516 = vmatprep.subr.mxu0 %v1720_v0  ;;  %1559 = vmatprep.subr.mxu1 %v1720_v0 }
 0x126   :  { %1517 = vmatpush3.msra.mxu0 %v1917_v5  ;;  %1560 = vmatpush3.msra.mxu1 %v1950_v23 }
 0x127   :  { %1518 = vmatprep.subr.mxu0 %v1720_v0  ;;  %1561 = vmatprep.subr.mxu1 %v1720_v0 }
 0x128   :  { %1519 = vmatpush3.msra.mxu0 %v1931_v12  ;;  %1562 = vmatpush3.msra.mxu1 %v1965_v29 }
 0x129   :  { %1520 = vmatprep.subr.mxu0 %v1720_v0  ;;  %1563 = vmatprep.subr.mxu1 %v1720_v0 }
 0x12a   :  { %1521 = vmatpush3.msra.mxu0 %v1938_v16  ;;  %1564 = vmatpush3.msra.mxu1 %v1978_v45 }
 0x12b   :  { %1522 = vmatprep.subr.mxu0 %v1720_v0  ;;  %1565 = vmatprep.subr.mxu1 %v1720_v0 }
 0x12c   :  { %1523 = vmatpush3.msra.mxu0 %v1948_v22  ;;  %1566 = vmatpush3.msra.mxu1 %v1986_v50 }
 0x12d   :  { %1524 = vmatprep.subr.mxu0 %v1720_v0  ;;  %1567 = vmatprep.subr.mxu1 %v1720_v0 }
 0x12e   :  { %1525 = vmatpush3.msra.mxu0 %v1963_v28  ;;  %1568 = vmatpush3.msra.mxu1 %v2000_v2 }
 0x12f   :  { %1526 = vmatprep.subr.mxu0 %v1720_v0  ;;  %1569 = vmatprep.subr.mxu1 %v1720_v0 }
 0x130   :  { %1527 = vmatpush3.msra.mxu0 %v1975_v43  ;;  %1570 = vmatpush3.msra.mxu1 %v2010_v14 }
 0x131   :  { %1528 = vmatprep.subr.mxu0 %v1720_v0  ;;  %1572 = vmatmul.mubr.f32.vlgmr.msra.gmra.mxu1 %v660_v47 }
 0x132   :  { %1609 = vmatprep.subr.mxu1 %v1720_v0  ;;  %1529 = vmatpush3.msra.mxu0 %v1990_v52 }
 0x133   :  { %1610 = vmatpush3.msra.mxu1 %v1811_v34  ;;  %1530 = vmatprep.subr.mxu0 %v1720_v0  ;;  %v2222_v34 = vand.u32 4294901760, %v1963_v28 }
 0x134   :  { %1611 = vmatprep.subr.mxu1 %v1720_v0  ;;  %1531 = vmatpush3.msra.mxu0 %v1998_v1 }
 0x135   :  { %1612 = vmatpush3.msra.mxu1 %v1818_v36  ;;  %1532 = vmatprep.subr.mxu0 %v1720_v0  ;;  %v2223_v36 = vand.u32 4294901760, %v1975_v43 }
 0x136   :  { %1613 = vmatprep.subr.mxu1 %v1720_v0  ;;  %1533 = vmatpush3.msra.mxu0 %v2008_v13 }
 0x137   :  { %1614 = vmatpush3.msra.mxu1 %v1826_v38  ;;  %1534 = vmatprep.subr.mxu0 %v1720_v0  ;;  %v2225_v38 = vand.u32 4294901760, %v1998_v1 }
 0x138   :  { %1615 = vmatprep.subr.mxu1 %v1720_v0  ;;  %1535 = vmatpush3.msra.mxu0 %v2023_v24 }
 0x139   :  { %1536 = vmatprep.mubr.msk.f32.mxu0 %vm1721_vm0, %v1720_v0  ;;  %1616 = vmatpush3.msra.mxu1 %v1884_v51 }
 0x13a   :  { %1537 = vmatmul.mubr.f32.vlgmr.msra.gmra.mxu0 %v2046_v35  ;;  %1574 = vmatprep.subr.mxu0 %v1720_v0 }
 0x13b   :  { %1617 = vmatprep.subr.mxu1 %v1720_v0  ;;  %1575 = vmatpush3.msra.mxu0 %v671_v40  ;;  %v2227_v40 = vand.u32 4294901760, %v2023_v24 }
 0x13c   :  { %1618 = vmatpush3.msra.mxu1 %v1889_v54  ;;  %1576 = vmatprep.subr.mxu0 %v1720_v0 }
 0x13d   :  { %1619 = vmatprep.subr.mxu1 %v1720_v0  ;;  %1577 = vmatpush3.msra.mxu0 %v678_v42 }
 0x13e   :  { %1620 = vmatpush3.msra.mxu1 %v1897_v58  ;;  %1578 = vmatprep.subr.mxu0 %v1720_v0 }
 0x13f   :  { %1621 = vmatprep.subr.mxu1 %v1720_v0  ;;  %1579 = vmatpush3.msra.mxu0 %v685_v44 }
 0x140   :  { %1622 = vmatpush3.msra.mxu1 %v1908_v63  ;;  %1580 = vmatprep.subr.mxu0 %v1720_v0 }
 0x141   :  { %1623 = vmatprep.subr.mxu1 %v1720_v0  ;;  %1581 = vmatpush3.msra.mxu0 %v692_v56 }
 0x142   :  { %1624 = vmatpush3.msra.mxu1 %v1920_v6  ;;  %1582 = vmatprep.subr.mxu0 %v1720_v0  ;;  %v1235_v6 = vld [vmem:[%s2214_s4] ss:$0 sm:$0xff] }
 0x143   :  { %1625 = vmatprep.subr.mxu1 %v1720_v0  ;;  %1583 = vmatpush3.msra.mxu0 %v699_v61 }
 0x144   :  { %1626 = vmatpush3.msra.mxu1 %v1927_v11  ;;  %1584 = vmatprep.subr.mxu0 %v1720_v0 }
 0x145   :  { %1627 = vmatprep.subr.mxu1 %v1720_v0  ;;  %1585 = vmatpush3.msra.mxu0 %v706_v4 }
 0x146   :  { %1628 = vmatpush3.msra.mxu1 %v1940_v17  ;;  %1586 = vmatprep.subr.mxu0 %v1720_v0 }
 0x147   :  { %1629 = vmatprep.subr.mxu1 %v1720_v0  ;;  %1587 = vmatpush3.msra.mxu0 %v713_v10 }
 0x148   :  { %1630 = vmatpush3.msra.mxu1 %v1950_v23  ;;  %1588 = vmatprep.subr.mxu0 %v1720_v0 }
 0x149   :  { %1631 = vmatprep.subr.mxu1 %v1720_v0  ;;  %1589 = vmatpush3.msra.mxu0 %v720_v18 }
 0x14a   :  { %1632 = vmatpush3.msra.mxu1 %v1965_v29  ;;  %1590 = vmatprep.subr.mxu0 %v1720_v0 }
 0x14b   :  { %1633 = vmatprep.subr.mxu1 %v1720_v0  ;;  %1591 = vmatpush3.msra.mxu0 %v727_v21 }
 0x14c   :  { %1634 = vmatpush3.msra.mxu1 %v1978_v45  ;;  %1592 = vmatprep.subr.mxu0 %v1720_v0 }
 0x14d   :  { %1635 = vmatprep.subr.mxu1 %v1720_v0  ;;  %1593 = vmatpush3.msra.mxu0 %v734_v27 }
 0x14e   :  { %1636 = vmatpush3.msra.mxu1 %v1986_v50  ;;  %1594 = vmatprep.subr.mxu0 %v1720_v0 }
 0x14f   :  { %1637 = vmatprep.subr.mxu1 %v1720_v0  ;;  %1595 = vmatpush3.msra.mxu0 %v2222_v34 }
 0x150   :  { %1638 = vmatpush3.msra.mxu1 %v2000_v2  ;;  %1596 = vmatprep.subr.mxu0 %v1720_v0 }
 0x151   :  { %1639 = vmatprep.subr.mxu1 %v1720_v0  ;;  %1597 = vmatpush3.msra.mxu0 %v2223_v36 }
 0x152   :  { %1640 = vmatpush3.msra.mxu1 %v2010_v14  ;;  %1641 = vmatprep.mubr.msk.f32.mxu1 %vm1721_vm0, %v1720_v0 }
 0x153   :  { %1598 = vmatprep.subr.mxu0 %v1720_v0  ;;  %1642 = vmatmul.mubr.f32.vlgmr.msra.gmra.mxu1 %v2043_v49 }
 0x154   :  { %1599 = vmatpush3.msra.mxu0 %v2224_v37  ;;  %1606 = vmatprep.mubr.msk.f32.mxu0 %vm1721_vm0, %v1720_v0 }
 0x155   :  { %1600 = vmatprep.subr.mxu0 %v1720_v0 }
 0x156   :  { %1601 = vmatpush3.msra.mxu0 %v2225_v38 }
 0x157   :  { %1602 = vmatprep.subr.mxu0 %v1720_v0 }
 0x158   :  { %1603 = vmatpush3.msra.mxu0 %v2226_v39 }
 0x159   :  { %1604 = vmatprep.subr.mxu0 %v1720_v0 }
 0x15a   :  { %1605 = vmatpush3.msra.mxu0 %v2227_v40 }
 0x15b   :  { %1607 = vmatmul.mubr.f32.vlgmr.msra.gmra.mxu0 %v2043_v49 }
 0x1d1   :  { %v815_v41 = vpop.f32.mrf.mxu1 }
 0x1d3   :  { %v1503_v42 = vpop.f32.mrf.mxu1 }
 0x1d9   :  { %v664_v44 = vpop.f32.mrf.mxu0 }
 0x1da   :  { %v816_v61 = vadd.f32 %v815_v41, %v664_v44 }
 0x1db   :  { %v1468_v51 = vpop.f32.mrf.mxu0 }
 0x1f1   :  { %v1008_v53 = vpop.f32.mrf.mxu1 }
 0x1f3   :  { %v1573_v54 = vpop.f32.mrf.mxu1 }
 0x1fa   :  { %v919_v56 = vpop.f32.mrf.mxu0 }
 0x1fb   :  { %v920_v63 = vadd.f32 %v919_v56, %v816_v61 }
 0x1fc   :  { %v1538_v57 = vpop.f32.mrf.mxu0 }
 0x1fd   :  { %v1009_v4 = vadd.f32 %v1008_v53, %v920_v63 }
 0x213   :  { %v1214_v58 = vpop.f32.mrf.mxu1 }
 0x215   :  { %v1643_v62 = vpop.f32.mrf.mxu1 }
 0x21b   :  { %v1127_v5 = vpop.f32.mrf.mxu0 }
 0x21c   :  { %v1128_v0 = vadd.f32 %v1127_v5, %v1009_v4 }
 0x21d   :  { %v1608_v10 = vpop.f32.mrf.mxu0 }
 0x21e   :  { %v1215_v11 = vadd.f32 %v1214_v58, %v1128_v0 }
 0x220   :  { %v1225_v12 = vadd.f32 %v1235_v6, %v1215_v11 }
 0x222   :  { %1227 = vst.msk [vmem:[%s2215_s5] sm:$0xff] %vm1226_vm2, %v1225_v12 }
 0x223   :  { %1232 = vsyncpa [#allocation3], 1 }
 0x224   :  { %1233 = vsyncpa [#allocation5], 1 }

</bundles_post_ra>
